<compile_context>
chip_gen: v7x
topology: tpu7x:2x2x1
jax: 0.10.0
libtpu: 0.0.40
codegen_flags: <defaults>
</compile_context>

<pallas_src>
import math
from functools import partial

import jax
import jax.numpy as jnp
from jax import lax
from jax.experimental import pallas as pl
from jax.experimental.pallas import tpu as pltpu


def _round_up(x, m):
    return ((x + m - 1) // m) * m


def _vmem_cap_bytes():
    """Physical VMEM per TensorCore, with headroom (generation-aware)."""
    try:
        phys = int(pltpu.get_tpu_info().vmem_capacity_bytes)
    except Exception:
        phys = 64 << 20                       # conservative (v7x) fallback
    return max(32 << 20, (phys * 3) // 4)     # ~48 MiB on v7x, ~96 MiB on v5e/v6e


def _conv_gemm_kernel(lhs_ref, w_ref, p_ref, o_ref, acc_ref, *,
                      activation, weight_resident, tkc):
    """One (TM, TCO) output tile, accumulated over the Kc grid axis.

    lhs_ref: (TM, TKc)  bf16 im2col patch tile
    w_ref  : (TKc, TCO) bf16  — or (Kc_pad, TCO) when weight_resident
    p_ref  : (8, TCO)   f32   row0 = scale, row1 = shift, row2 = PReLU alpha
    o_ref  : (TCO, TM)        transposed output tile (written on last k)
    acc_ref: (TM, TCO)  f32   VMEM accumulator scratch
    """
    k = pl.program_id(3)

    @pl.when(k == 0)
    def _init():
        acc_ref[...] = jnp.zeros_like(acc_ref)

    if weight_resident:
        start = pl.multiple_of(k * tkc, tkc)
        w = w_ref[pl.ds(start, tkc), :]
    else:
        w = w_ref[...]
    acc_ref[...] += jnp.dot(lhs_ref[...], w, preferred_element_type=jnp.float32)

    @pl.when(k == pl.num_programs(3) - 1)
    def _epilogue():
        p = p_ref[...]
        y = acc_ref[...] * p[0:1, :] + p[1:2, :]   # conv bias + eval-mode BN folded
        if activation == "prelu":
            y = jnp.where(y >= 0, y, p[2:3, :] * y)
        elif activation == "leakyrelu":
            y = jnp.where(y >= 0, y, 0.2 * y)
        elif activation == "tanh":
            y = jnp.tanh(y)
        # In-kernel transpose (XLU slot is otherwise idle) -> channel-major
        # output; removes the standalone NHWC->NCHW transpose pass in HBM.
        o_ref[...] = y.T.astype(o_ref.dtype)


def conv_block_forward(x_nchw, weight, bias, *, stride=1, batch_norm=False,
                       bn_params=None, activation=None, prelu_alpha=0.25,
                       eps=1e-5, compute_dtype=jnp.bfloat16,
                       weight_resident=None):
    """Pallas implementation of ConvolutionalBlock.forward (NCHW in / NCHW out)."""
    if activation is not None:
        activation = activation.lower()
        assert activation in {"prelu", "leakyrelu", "tanh"}

    N, Cin, H, W = x_nchw.shape
    Cout, Cin_w, K, K2 = weight.shape
    assert Cin_w == Cin and K == K2
    pad = K // 2
    Ho = (H + 2 * pad - K) // stride + 1
    Wo = (W + 2 * pad - K) // stride + 1
    M = Ho * Wo
    Kc = K * K * Cin
    out_dtype = x_nchw.dtype

    # ---- tiling: Kc tiled at <=512 so VMEM is bounded independent of Cin*K^2 ----
    TKC_MAX = 512
    Kc_pad = _round_up(Kc, 128)
    if Kc_pad > TKC_MAX:
        TKc = TKC_MAX
        Kc_pad = _round_up(Kc, TKc)
    else:
        TKc = Kc_pad
    n_k = Kc_pad // TKc

    Cout_pad = _round_up(Cout, 128)
    TCO = 256 if Cout_pad >= 256 else Cout_pad      # 256^2 MXU on v6e/v7x
    Cout_pad = _round_up(Cout_pad, TCO)

    # Shallow contraction -> bigger spatial tile amortizes per-step overhead.
    TM_target = 512 if Kc_pad <= 256 else 256
    TM = TM_target if M >= TM_target else _round_up(M, 16)   # 16: bf16 packing
    M_pad = _round_up(M, TM)

    # ---- wrapper layout plumbing: cast to bf16 FIRST, then (strided) im2col ----
    x_nhwc = jnp.transpose(x_nchw, (0, 2, 3, 1)).astype(compute_dtype)
    x_padded = jnp.pad(x_nhwc, ((0, 0), (pad, pad), (pad, pad), (0, 0)))
    cols = []
    for kh in range(K):
        for kw in range(K):
            cols.append(x_padded[:,
                                 kh:kh + (Ho - 1) * stride + 1:stride,
                                 kw:kw + (Wo - 1) * stride + 1:stride, :])
    patches = jnp.concatenate(cols, axis=-1).reshape(N, M, Kc)   # (kh, kw, cin)
    lhs = jnp.pad(patches, ((0, 0), (0, M_pad - M), (0, Kc_pad - Kc)))

    # OIHW -> (K, K, Cin, Cout) -> (Kc, Cout): matches the tap order above.
    w2d = jnp.transpose(weight, (2, 3, 1, 0)).reshape(Kc, Cout).astype(compute_dtype)
    rhs = jnp.pad(w2d, ((0, Kc_pad - Kc), (0, Cout_pad - Cout)))

    # ---- fold conv-bias + eval-mode BN into one per-channel affine ----
    if bias is None:
        bias = jnp.zeros((Cout,), jnp.float32)
    bias = bias.astype(jnp.float32)
    if batch_norm:
        gamma, beta, running_mean, running_var = bn_params
        scale = gamma.astype(jnp.float32) / jnp.sqrt(
            running_var.astype(jnp.float32) + eps)
        shift = (bias - running_mean.astype(jnp.float32)) * scale \
            + beta.astype(jnp.float32)
    else:
        scale = jnp.ones((Cout,), jnp.float32)
        shift = bias
    # PReLU slope: scalar (nn.PReLU() default) or per-channel array.
    alpha = jnp.broadcast_to(jnp.asarray(prelu_alpha, jnp.float32), (Cout,))
    params = jnp.zeros((8, Cout_pad), jnp.float32)
    params = params.at[0, :Cout].set(scale)
    params = params.at[1, :Cout].set(shift)
    params = params.at[2, :Cout].set(alpha)

    # ---- weight residency (issue the weight DMA once; big win on v5e) ----
    bpe = jnp.dtype(compute_dtype).itemsize
    out_bpe = jnp.dtype(out_dtype).itemsize
    w_bytes = Kc_pad * Cout_pad * bpe
    if weight_resident is None:
        weight_resident = (Cout_pad == TCO) and (w_bytes <= (4 << 20))
    else:
        weight_resident = bool(weight_resident) and (Cout_pad == TCO) \
            and (w_bytes <= (8 << 20))

    if weight_resident:
        w_spec = pl.BlockSpec((Kc_pad, TCO), lambda n, i, j, k: (0, 0))
    else:
        w_spec = pl.BlockSpec((TKc, TCO), lambda n, i, j, k: (k, j))

    # ---- grid / VMEM budget / cost estimate ----
    grid = (N, M_pad // TM, Cout_pad // TCO, n_k)

    block_bytes = (2 * TM * TKc * bpe
                   + 2 * (Kc_pad if weight_resident else TKc) * TCO * bpe
                   + 2 * 8 * TCO * 4
                   + 2 * TCO * TM * out_bpe
                   + TM * TCO * 4)
    vmem_limit = int(min(max(4 * block_bytes, 32 << 20), _vmem_cap_bytes()))

    cost = pl.CostEstimate(
        flops=2 * N * M_pad * Kc_pad * Cout_pad,
        transcendentals=(N * M_pad * Cout_pad) if activation == "tanh" else 0,
        bytes_accessed=(N * M_pad * Kc_pad * bpe + Kc_pad * Cout_pad * bpe
                        + 8 * Cout_pad * 4 + N * Cout_pad * M_pad * out_bpe),
    )

    kernel = partial(_conv_gemm_kernel, activation=activation,
                     weight_resident=weight_resident, tkc=TKc)

    out = pl.pallas_call(
        kernel,
        out_shape=jax.ShapeDtypeStruct((N, Cout_pad, M_pad), out_dtype),
        grid_spec=pltpu.PrefetchScalarGridSpec(
            num_scalar_prefetch=0,
            grid=grid,
            in_specs=[
                pl.BlockSpec((pl.Squeezed(), TM, TKc),
                             lambda n, i, j, k: (n, i, k)),
                w_spec,
                pl.BlockSpec((8, TCO), lambda n, i, j, k: (0, j)),
            ],
            out_specs=pl.BlockSpec((pl.Squeezed(), TCO, TM),
                                   lambda n, i, j, k: (n, j, i)),
            scratch_shapes=[pltpu.VMEM((TM, TCO), jnp.float32)],
        ),
        compiler_params=pltpu.CompilerParams(
            dimension_semantics=("parallel", "parallel", "parallel", "arbitrary"),
            vmem_limit_bytes=vmem_limit),
        cost_estimate=cost,
    )(lhs, rhs, params)

    # Output is already channel-major (N, Cout_pad, M_pad): slice + reshape only.
    return out[:, :Cout, :M].reshape(N, Cout, Ho, Wo)


def _reference_forward(x_nchw, weight, bias, *, stride, batch_norm, bn_params,
                       activation, prelu_alpha, eps=1e-5,
                       compute_dtype=jnp.bfloat16):
    """Pure-JAX reference mirroring the PyTorch block (eval mode), with the same
    bf16 operand rounding as the kernel so the comparison is apples-to-apples."""
    Cout = weight.shape[0]
    pad = weight.shape[-1] // 2
    xq = x_nchw.astype(compute_dtype).astype(jnp.float32)
    wq = weight.astype(compute_dtype).astype(jnp.float32)
    y = lax.conv_general_dilated(
        xq, wq, window_strides=(stride, stride),
        padding=[(pad, pad), (pad, pad)],
        dimension_numbers=("NCHW", "OIHW", "NCHW"),
        precision=lax.Precision.HIGHEST)
    y = y + bias[None, :, None, None]
    if batch_norm:
        gamma, beta, mean, var = bn_params
        y = (y - mean[None, :, None, None]) / jnp.sqrt(
            var[None, :, None, None] + eps)
        y = y * gamma[None, :, None, None] + beta[None, :, None, None]
    if activation == "prelu":
        a = jnp.broadcast_to(jnp.asarray(prelu_alpha, jnp.float32), (Cout,))
        y = jnp.where(y >= 0, y, a[None, :, None, None] * y)
    elif activation == "leakyrelu":
        y = jnp.where(y >= 0, y, 0.2 * y)
    elif activation == "tanh":
        y = jnp.tanh(y)
    return y


if __name__ == "__main__":
    key = jax.random.PRNGKey(0)
    N, H, W = 2, 16, 16

    configs = [
        # Baseline SRGAN-style block.
        dict(Cin=4, Cout=8, K=3, stride=1, batch_norm=True,
             activation="prelu", weight_resident=None),
        # Strided conv, no BN.
        dict(Cin=4, Cout=8, K=3, stride=2, batch_norm=False,
             activation="leakyrelu", weight_resident=None),
        # Deep contraction: Kc_pad = 1024 -> exercises the Kc-tiled accumulator.
        dict(Cin=64, Cout=8, K=3, stride=1, batch_norm=True,
             activation="tanh", weight_resident=None),
        # Force the streamed-weight (non-resident) path.
        dict(Cin=4, Cout=8, K=3, stride=1, batch_norm=False,
             activation=None, weight_resident=False),
        # Wide Cout -> TCO = 256, two Cout tiles, streamed weights.
        dict(Cin=4, Cout=272, K=3, stride=1, batch_norm=False,
             activation="prelu", weight_resident=None),
    ]

    for idx, cfg in enumerate(configs):
        key, kx, kw, kb, kg, kbt, km, kv = jax.random.split(key, 8)
        Cin, Cout, K = cfg["Cin"], cfg["Cout"], cfg["K"]
        x = jax.random.normal(kx, (N, Cin, H, W), jnp.float32)

        # PyTorch-style Conv2d init (uniform with bound = 1/sqrt(fan_in)).
        fan_in = Cin * K * K
        bound = 1.0 / math.sqrt(fan_in)
        weight = jax.random.uniform(kw, (Cout, Cin, K, K), jnp.float32,
                                    -bound, bound)
        bias = jax.random.uniform(kb, (Cout,), jnp.float32, -bound, bound)

        if cfg["batch_norm"]:
            gamma = jax.random.uniform(kg, (Cout,), jnp.float32, 0.5, 1.5)
            beta = jax.random.uniform(kbt, (Cout,), jnp.float32, -0.5, 0.5)
            running_mean = jax.random.uniform(km, (Cout,), jnp.float32, -0.3, 0.3)
            running_var = jax.random.uniform(kv, (Cout,), jnp.float32, 0.5, 1.5)
            bn_params = (gamma, beta, running_mean, running_var)
        else:
            bn_params = None

        out = conv_block_forward(
            x, weight, bias, stride=cfg["stride"], batch_norm=cfg["batch_norm"],
            bn_params=bn_params, activation=cfg["activation"],
            prelu_alpha=0.25, weight_resident=cfg["weight_resident"])
        out = jax.block_until_ready(out)

        ref = _reference_forward(
            x, weight, bias, stride=cfg["stride"], batch_norm=cfg["batch_norm"],
            bn_params=bn_params, activation=cfg["activation"], prelu_alpha=0.25)

        Ho = (H + 2 * (K // 2) - K) // cfg["stride"] + 1
        assert out.shape == (N, Cout, Ho, Ho), (idx, out.shape)
        err = float(jnp.max(jnp.abs(out - ref)))
        assert err < 2e-3, (idx, err)

    print("KERNEL_OK")
</pallas_src>

<mosaic_0001>
module attributes {stable_mosaic.version = 11 : i64} {
  func.func @_conv_gemm_kernel(%arg0: i32, %arg1: i32, %arg2: i32, %arg3: i32, %arg4: memref<1x256x128xbf16, #tpu.memory_space<vmem>>, %arg5: memref<128x128xbf16, #tpu.memory_space<vmem>>, %arg6: memref<8x128xf32, #tpu.memory_space<vmem>>, %arg7: memref<1x128x256xf32, #tpu.memory_space<vmem>>, %arg8: memref<256x128xf32, #tpu.memory_space<vmem>>) attributes {dimension_semantics = [#tpu.dimension_semantics<parallel>, #tpu.dimension_semantics<parallel>, #tpu.dimension_semantics<parallel>, #tpu.dimension_semantics<arbitrary>], iteration_bounds = array<i64: 2, 1, 1, 1>, scalar_prefetch = 0 : i64, scratch_operands = 1 : i64, tpu.core_type = #tpu.core_type<tc>, window_params = [{transform_indices = @transform_0, window_bounds = array<i64: 1, 256, 128>}, {pipeline_mode = #tpu.pipeline_mode<synchronous>, transform_indices = @transform_1, window_bounds = array<i64: 128, 128>}, {transform_indices = @transform_2, window_bounds = array<i64: 8, 128>}, {transform_indices = @transform_3, window_bounds = array<i64: 1, 128, 256>}]} {
    %c0_i32 = arith.constant 0 : i32
    %0 = arith.cmpi eq, %arg3, %c0_i32 : i32
    %1 = arith.extui %0 : i1 to i32
    %c0_i32_0 = arith.constant 0 : i32
    %2 = arith.cmpi ne, %1, %c0_i32_0 : i32
    scf.if %2 {
      %cst_10 = arith.constant 0.000000e+00 : f32
      %16 = vector.broadcast %cst_10 : f32 to vector<256x128xf32>
      %c0_11 = arith.constant 0 : index
      %c0_12 = arith.constant 0 : index
      %17 = vector.load %arg8[%c0_11, %c0_12] : memref<256x128xf32, #tpu.memory_space<vmem>>, vector<256x128xf32>
      tpu.vector_store %arg8[%c0_11, %c0_12], %16 {strides = array<i32>} : memref<256x128xf32, #tpu.memory_space<vmem>>, vector<256x128xf32>,
    } else {
    }
    %c128_i32 = arith.constant 128 : i32
    %3 = arith.muli %arg3, %c128_i32 : i32
    %4 = tpu.assume_multiple %3, 128 : i32
    %5 = arith.index_cast %4 : i32 to index
    %c0 = arith.constant 0 : index
    %6 = vector.load %arg5[%5, %c0] : memref<128x128xbf16, #tpu.memory_space<vmem>>, vector<128x128xbf16>
    %c0_1 = arith.constant 0 : index
    %c0_2 = arith.constant 0 : index
    %7 = vector.load %arg8[%c0_1, %c0_2] : memref<256x128xf32, #tpu.memory_space<vmem>>, vector<256x128xf32>
    %c0_3 = arith.constant 0 : index
    %c0_4 = arith.constant 0 : index
    %c0_5 = arith.constant 0 : index
    %8 = vector.load %arg4[%c0_3, %c0_4, %c0_5] : memref<1x256x128xbf16, #tpu.memory_space<vmem>>, vector<1x256x128xbf16>
    %9 = vector.shape_cast %8 : vector<1x256x128xbf16> to vector<256x128xbf16>
    %cst = arith.constant dense<0.000000e+00> : vector<256x128xf32>
    %10 = tpu.matmul %9, %6, %cst {dimension_numbers = #tpu.dot_dimension_numbers<[1], [0], [0], [1], [0, 0, 1, 1], [], []>} : vector<256x128xbf16>, vector<128x128xbf16>, vector<256x128xf32> -> vector<256x128xf32>
    %11 = arith.addf %7, %10 : vector<256x128xf32>
    %c0_6 = arith.constant 0 : index
    %c0_7 = arith.constant 0 : index
    %12 = vector.load %arg8[%c0_6, %c0_7] : memref<256x128xf32, #tpu.memory_space<vmem>>, vector<256x128xf32>
    tpu.vector_store %arg8[%c0_6, %c0_7], %11 {strides = array<i32>} : memref<256x128xf32, #tpu.memory_space<vmem>>, vector<256x128xf32>,
    %c0_i32_8 = arith.constant 0 : i32
    %13 = arith.cmpi eq, %arg3, %c0_i32_8 : i32
    %14 = arith.extui %13 : i1 to i32
    %c0_i32_9 = arith.constant 0 : i32
    %15 = arith.cmpi ne, %14, %c0_i32_9 : i32
    scf.if %15 {
      %c0_10 = arith.constant 0 : index
      %c0_11 = arith.constant 0 : index
      %16 = vector.load %arg6[%c0_10, %c0_11] : memref<8x128xf32, #tpu.memory_space<vmem>>, vector<8x128xf32>
      %c0_12 = arith.constant 0 : index
      %c0_13 = arith.constant 0 : index
      %17 = vector.load %arg8[%c0_12, %c0_13] : memref<256x128xf32, #tpu.memory_space<vmem>>, vector<256x128xf32>
      %18 = vector.extract_strided_slice %16 {offsets = [0, 0], sizes = [1, 128], strides = [1, 1]} : vector<8x128xf32> to vector<1x128xf32>
      %19 = vector.broadcast %18 : vector<1x128xf32> to vector<256x128xf32>
      %20 = arith.mulf %17, %19 : vector<256x128xf32>
      %21 = vector.extract_strided_slice %16 {offsets = [1, 0], sizes = [1, 128], strides = [1, 1]} : vector<8x128xf32> to vector<1x128xf32>
      %22 = vector.broadcast %21 : vector<1x128xf32> to vector<256x128xf32>
      %23 = arith.addf %20, %22 : vector<256x128xf32>
      %cst_14 = arith.constant 0.000000e+00 : f32
      %24 = vector.broadcast %cst_14 : f32 to vector<256x128xf32>
      %25 = arith.cmpf oge, %23, %24 : vector<256x128xf32>
      %26 = vector.extract_strided_slice %16 {offsets = [2, 0], sizes = [1, 128], strides = [1, 1]} : vector<8x128xf32> to vector<1x128xf32>
      %27 = vector.broadcast %26 : vector<1x128xf32> to vector<256x128xf32>
      %28 = arith.mulf %27, %23 : vector<256x128xf32>
      %29 = arith.select %25, %23, %28 : vector<256x128xi1>, vector<256x128xf32>
      %30 = tpu.transpose %29, [1, 0] : vector<256x128xf32> -> vector<128x256xf32>
      %c0_15 = arith.constant 0 : index
      %c0_16 = arith.constant 0 : index
      %c0_17 = arith.constant 0 : index
      %31 = vector.load %arg7[%c0_15, %c0_16, %c0_17] : memref<1x128x256xf32, #tpu.memory_space<vmem>>, vector<1x128x256xf32>
      %32 = vector.shape_cast %31 : vector<1x128x256xf32> to vector<128x256xf32>
      %33 = vector.shape_cast %30 : vector<128x256xf32> to vector<1x128x256xf32>
      tpu.vector_store %arg7[%c0_15, %c0_16, %c0_17], %33 {strides = array<i32>} : memref<1x128x256xf32, #tpu.memory_space<vmem>>, vector<1x128x256xf32>,
    } else {
    }
    return
  }
  func.func @transform_0(%arg0: i32, %arg1: i32, %arg2: i32, %arg3: i32) -> (i32, i32, i32) {
    %c0_i32 = arith.constant 0 : i32
    return %arg0, %arg1, %arg3 : i32, i32, i32
  }
  func.func @transform_1(%arg0: i32, %arg1: i32, %arg2: i32, %arg3: i32) -> (i32, i32) {
    %c0_i32 = arith.constant 0 : i32
    %c0_i32_0 = arith.constant 0 : i32
    %c0_i32_1 = arith.constant 0 : i32
    return %c0_i32, %c0_i32_0 : i32, i32
  }
  func.func @transform_2(%arg0: i32, %arg1: i32, %arg2: i32, %arg3: i32) -> (i32, i32) {
    %c0_i32 = arith.constant 0 : i32
    %c0_i32_0 = arith.constant 0 : i32
    return %c0_i32, %arg2 : i32, i32
  }
  func.func @transform_3(%arg0: i32, %arg1: i32, %arg2: i32, %arg3: i32) -> (i32, i32, i32) {
    %c0_i32 = arith.constant 0 : i32
    return %arg0, %arg2, %arg1 : i32, i32, i32
  }
}

</mosaic_0001>

<bundles_post_ra>
// kernel: tpu_custom_call.1
= control target key start
LH: loop header
LB: loop body
LE: loop exit
PB: predicated region body
PF: predicated region fallthrough
CT: control target
= control target key end

     0   :  { %8 = vsyncpa [#allocation4], 0  ;;  %s2086_s0 = inlined_call_operand.hbm [shape: bf16[2,256,128], index: 0, kind: input, shape index: {}]   ;;  %s2087_s1 = inlined_call_operand.hbm [shape: bf16[128,128], index: 1, kind: input, shape index: {}]   ;;  %s2088_s2 = inlined_call_operand.hbm [shape: f32[8,128], index: 2, kind: input, shape index: {}]   ;;  %s2089_s3 = inlined_call_operand.hbm [shape: f32[2,128,256], index: 3, kind: output, shape index: {}]  }
   0x1   :  { %10 = vsyncpa [#allocation4 + $0x1], 0 }
   0x2   :  { %11 = vsyncpa [#allocation7], 0 }
   0x3   :  { %12 = vsyncpa [#allocation5], 0 }
   0x4   :  { %14 = vsyncpa [#allocation5 + $0x1], 0  ;;  %s1642_s12 = smov 0   ;;  %s1644_s13 = smov 0  }
   0x5   :  { %s1646_s14 = smov 0   ;;  %s1648_s15 = smov 0  }
   0x6   :  { %s1650_s16 = smov 0   ;;  %s1652_s17 = smov 0  }
   0x7 LB: > { %s1196_s18 = sadd.s32 4294967295, %s1612_s17   ;;  %s1197_s19 = sadd.s32 4294967294, %s1612_s17   ;;  %s1612_s17 = sphi %s1652_s17, %s20_s17   ;;  %s1608_s16 = sphi %s1650_s16, %s2111_s16   ;;  %s1604_s15 = sphi %s1648_s15, %s2110_s15   ;;  %s1600_s14 = sphi %s1646_s14, %s2109_s14   ;;  %s1596_s13 = sphi %s1644_s13, %s2108_s13   ;;  %s1592_s12 = sphi %s1642_s12, %s2107_s12  }
   0x8   : > { %p70_p0 = scmp.ne.s32.totalorder %s1596_s13, %s1592_s12  ;;  %p1676_p1 = scmp.eq.s32.totalorder %s1196_s18, 0 }
   0x9   : > { %p1680_p2 = scmp.eq.s32.totalorder %s1196_s18, 1  ;;  %p151_p3 = scmp.eq.s32.totalorder %s1197_s19, 1 }
   0xa   : > { %s2094_s20 = scalar_select %p1676_p1, 1, 0 }
   0xb   : > { %p1686_p4 = por %p1676_p1, %p70_p0  ;;  %p1198_p5 = scmp.ge.s32.totalorder %s1612_s17, 1 }
   0xc   : > { %p1691_p6 = por %p151_p3, %p70_p0  ;;  %p158_p7 = scmp.lt.s32.totalorder %s1612_s17, 3 }
   0xd   : > { %s2096_s22 = scalar_select %p1686_p4, 1, 0 }
   0xe   : > { %s2097_s23 = scalar_select %p1691_p6, 1, 0 }
   0xf   : > { %p1696_p8 = pnand %p1198_p5, %p158_p7  ;;  %s1614_s25 = smov [#allocation6]  }
  0x10   : > { %s170_s26 = sshll.u32 %s1614_s25, 4  ;;  %s1615_s28 = smov [#allocation8]   ;;  %s1700_s26 = int_to_ptr.vmem [resolvable:$true] %s170_s26 }
  0x11   : > { %p1341_p9 = pneg %p1696_p8  ;;  %s186_s29 = sshll.u32 %s1615_s28, 4  ;;  %s1711_s29 = int_to_ptr.vmem [resolvable:$true] %s186_s29 }
  0x12   : > { %s1440_s5 = scalar_lea.hbm %s2087_s1, 1024 }
  0x13   : > { %p1707_p11 = pnand %p1341_p9, %p1676_p1  ;;  %p1441_p12 = scmp.ne.s32.totalorder %s2087_s1, %s1440_s5 }
  0x14   : > { %p1447_p5 = scmp.lt.u32.totalorder %s1440_s5, %s2087_s1 }
  0x15   : > { %p1442_p13 = pneg %p1707_p11 }
  0x17   : > { %p1443_p0 = pnand %p1442_p13, %p1441_p12 }
  0x19   : > { %p1444_p3 = pneg %p1443_p0 }
  0x1b   : > { %p1449_p7 = pnand %p1447_p5, %p1444_p3 }
  0x1d   : > { %1452 = shalt.err (!%p1449_p7)
}
  0x1e   : > { %s1453_s10 = scalar_lea.vmem %s1700_s26, 1024  ;;  %p1461_p1 = scmp.lt.s32.totalorder %s1700_s26, %s1700_s26 }
  0x1f   : > { %p1454_p9 = scmp.ne.s32.totalorder %s1700_s26, %s1453_s10  ;;  %p1462_p12 = scmp.lt.s32.totalorder %s1453_s10, %s1453_s10 }
  0x21   : > { %p1456_p10 = pnand %p1454_p9, %p1442_p13  ;;  %p1463_p0 = por %p1462_p12, %p1461_p1 }
  0x23   : > { %p1457_p6 = pneg %p1456_p10 }
  0x25   : > { %p1464_p4 = pnand %p1463_p0, %p1457_p6 }
  0x27   : > { %1467 = shalt.err (!%p1464_p4)
}
  0x28   : > { %s1616_s11 = smov 64   ;;  %s1617_s18 = smov 4  }
  0x29   : > { %1344 = dma.hbm_to_vmem [thread:$0]  (!%p1707_p11), %s2087_s1, 1024, %s1700_s26, [#allocation7], %s1616_s11, %s1616_s11, %s1617_s18  }
  0x2a   : > { %s1468_s4 = scalar_lea.hbm %s2088_s2, 128 }
  0x2b   : > { %p1469_p1 = scmp.ne.s32.totalorder %s2088_s2, %s1468_s4  ;;  %p1475_p10 = scmp.lt.u32.totalorder %s1468_s4, %s2088_s2 }
  0x2d   : > { %p1471_p4 = pnand %p1469_p1, %p1442_p13 }
  0x2f   : > { %p1472_p6 = pneg %p1471_p4 }
  0x31   : > { %p1477_p3 = pnand %p1475_p10, %p1472_p6 }
  0x33   : > { %1480 = shalt.err (!%p1477_p3)
}
  0x34   : > { %s1481_s26 = scalar_lea.vmem %s1711_s29, 128  ;;  %p1489_p12 = scmp.lt.s32.totalorder %s1711_s29, %s1711_s29 }
  0x35   : > { %p1482_p5 = scmp.ne.s32.totalorder %s1711_s29, %s1481_s26  ;;  %p1490_p0 = scmp.lt.s32.totalorder %s1481_s26, %s1481_s26 }
  0x37   : > { %p1484_p7 = pnand %p1482_p5, %p1442_p13  ;;  %p1491_p1 = por %p1490_p0, %p1489_p12 }
  0x39   : > { %p1485_p9 = pneg %p1484_p7 }
  0x3b   : > { %p1492_p4 = pnand %p1491_p1, %p1485_p9 }
  0x3d   : > { %1495 = shalt.err (!%p1492_p4)
}
  0x3e   : > { %1347 = dma.hbm_to_vmem [thread:$0]  (!%p1707_p11), %s2088_s2, 128, %s1711_s29, [#allocation7]  }
  0x3f   : > { %s46_s19 = sadd.s32 1, %s1608_s16  ;;  %s57_s25 = sadd.s32 1, %s1600_s14 }
  0x40   : > { %p48_p13 = scmp.ge.s32.totalorder %s46_s19, 2  ;;  %p64_p6 = scmp.ne.s32.totalorder %s1600_s14, %s1596_s13 }
  0x41   : > { %p65_p10 = scmp.eq.s32.totalorder %s1612_s17, 0  ;;  %p1358_p3 = scmp.lt.s32.totalorder %s1612_s17, 2 }
  0x42   : > { %s2113_s19 = smov (%p48_p13, %s46_s19), 0  ;;  %p1778_p7 = por %p1680_p2, %p64_p6 }
  0x43   : > { %p66_p5 = por %p65_p10, %p64_p6  ;;  %s50_s28 = ssub.s32 %s1608_s16, %s2113_s19 }
  0x44   : > { %s2100_s27 = scalar_select %p1778_p7, 1, 0 }
  0x45   : > { %s197_s30 = sand.u32 1, %s1600_s14   ;;  %p55_p9 = scmp.eq.s32.totalorder %s50_s28, 0 }
  0x46   : > { %s1202_s29 = sshll.u32 %s197_s30, 7  ;;  %s1239_s4 = sshll.u32 %s1608_s16, 11 }
  0x47   : > { %s1787_s5 = scalar_select %p55_p9, %s1600_s14, %s57_s25  }
  0x48   : > { %s1792_s8 = scalar_lea.hbm %s2086_s0, %s1239_s4  ;;  %s201_s21 = scalar_lea.vmem [#allocation3], %s1202_s29 }
  0x49   : > { %s211_s26 = sshll.u32 %s201_s21, 4  ;;  %p1796_p2 = pnand %p1358_p3, %p66_p5  ;;  %s1800_s26 = int_to_ptr.vmem [resolvable:$true] %s211_s26 }
  0x4a   : > { %s1802_s10 = scalar_lea.sflag [#allocation4], %s197_s30  ;;  %s1496_s25 = scalar_lea.hbm %s1792_s8, 2048 }
  0x4b   : > { %p1497_p11 = scmp.ne.s32.totalorder %s1792_s8, %s1496_s25  ;;  %p1498_p12 = pneg %p1796_p2 }
  0x4c   : > { %s1501_s4 = scalar_lea.hbm %s2086_s0, 4096  ;;  %p1502_p4 = scmp.lt.u32.totalorder %s1792_s8, %s2086_s0 }
  0x4d   : > { %p1499_p0 = pnand %p1498_p12, %p1497_p11  ;;  %p1503_p13 = scmp.lt.u32.totalorder %s1501_s4, %s1496_s25 }
  0x4e   : > { %p1505_p10 = scmp.lt.u32.totalorder %s1496_s25, %s1792_s8 }
  0x4f   : > { %p1500_p1 = pneg %p1499_p0  ;;  %p1504_p6 = por %p1503_p13, %p1502_p4 }
  0x51   : > { %p1506_p3 = por %p1505_p10, %p1504_p6 }
  0x53   : > { %p1507_p5 = pnand %p1506_p3, %p1500_p1 }
  0x55   : > { %1510 = shalt.err (!%p1507_p5)
}
  0x56   : > { %s1511_s30 = scalar_lea.vmem %s1800_s26, 2048  ;;  %s1618_s21 = smov [#allocation3]  }
  0x57   : > { %p1512_p9 = scmp.ne.s32.totalorder %s1800_s26, %s1511_s30  ;;  %s1516_s28 = sshll.u32 %s1618_s21, 4  ;;  %s1517_s28 = int_to_ptr.vmem [resolvable:$false] %s1516_s28 }
  0x58   : > { %s1518_s29 = scalar_lea.vmem %s1517_s28, 4096  ;;  %p1519_p7 = scmp.lt.s32.totalorder %s1800_s26, %s1517_s28 }
  0x59   : > { %p1514_p11 = pnand %p1512_p9, %p1498_p12  ;;  %p1520_p4 = scmp.lt.s32.totalorder %s1518_s29, %s1511_s30 }
  0x5b   : > { %p1515_p0 = pneg %p1514_p11  ;;  %p1521_p13 = por %p1520_p4, %p1519_p7 }
  0x5d   : > { %p1522_p6 = pnand %p1521_p13, %p1515_p0 }
  0x5f   : > { %1525 = shalt.err (!%p1522_p6)
}
  0x60   : > { %1351 = dma.hbm_to_vmem [thread:$0]  (!%p1796_p2), %s1792_s8, 2048, %s1800_s26, %s1802_s10, %s1616_s11, %s1616_s11, %s1617_s18  }
  0x61   : > { %223 = sbr.rel (%p1696_p8) target bundleno = 566 (0x236), region = 32  ;;  %s1836_s25 = sand.u32 (!%p1696_p8), 1, %s1596_s13  }
  0x62   : > { %s1206_s4 = sshll.u32 (!%p1696_p8), %s1836_s25, 7  ;;  %s226_s6 = scalar_lea.sflag (!%p1696_p8), [#allocation4], %s1836_s25 }
  0x63   : > { %s1840_s7 = scalar_lea.vmem (!%p1696_p8), [#allocation3], %s1206_s4  ;;  %p2102_p7 = scmp.ne.s32.totalorder (!%p1696_p8), %s2096_s22, 0 }
  0x68   : > { %1579 = dma.done.wait (%p2102_p7), %s226_s6, 2048  }
  0x69   : > { %1581 = vsyncadd (%p2102_p7), %s226_s6, 4294965248  ;;  %p2103_p2 = scmp.ne.s32.totalorder %s2094_s20, 0 }
  0x6b   : > { %1583 = dma.done.wait (%p2103_p2), [#allocation7], 1152  }
  0x6c   : > { %1585 = vsyncadd (%p2103_p2), [#allocation7], 4294966144  ;;  %v1416_v0 = vld [vmem:[#allocation6] sm:$0xff]   ;;  %v1417_v1 = vld [vmem:[#allocation6 + $0x8] sm:$0xff]   ;;  %v790_v24 = vlaneseq  ;;  %s1209_s20 = sshll.u32 %s1836_s25, 8  ;;  %s1240_s24 = sshll.u32 %s1604_s15, 12 }
  0x6d   : > { %1265 = vmatprep.subr.bf16.mxu0 %v1416_v0  ;;  %1313 = vmatprep.subr.bf16.mxu1 %v1416_v0  ;;  %v1418_v2 = vld [vmem:[#allocation6 + $0x10] sm:$0xff]   ;;  %v1419_v3 = vld [vmem:[#allocation6 + $0x18] sm:$0xff]   ;;  %v1424_v4 = vld [vmem:[%s1840_s7] sm:$0xff]   ;;  %s1996_s22 = scalar_lea.vmem [#allocation9], %s1209_s20  ;;  %s2033_s26 = scalar_lea.hbm %s2089_s3, %s1240_s24 }
  0x6e   : > { %1266 = vmatpush3.bf16.msra.mxu0 %v1416_v0  ;;  %1321 = vmatpush3.bf16.msra.mxu1 %v1416_v0  ;;  %v1425_v5 = vld [vmem:[%s1840_s7 + $0x40] sm:$0xff]   ;;  %v1421_v7 = vld [vmem:[#allocation6 + $0x28] sm:$0xff]   ;;  %v1422_v8 = vld [vmem:[#allocation6 + $0x30] sm:$0xff]   ;;  %v791_v25 = vshrl.u32 %v790_v24, 7  ;;  %s1077_s11 = sshll.u32 %s1996_s22, 4  ;;  %s1059_s9 = scalar_lea.sflag [#allocation5], %s1836_s25  ;;  %s2035_s11 = int_to_ptr.vmem [resolvable:$true] %s1077_s11 }
  0x6f   : > { %1267 = vmatprep.subr.bf16.mxu0 %v1417_v1  ;;  %1314 = vmatprep.subr.bf16.mxu1 %v1417_v1  ;;  %v1420_v6 = vld [vmem:[#allocation6 + $0x20] sm:$0xff]   ;;  %v1423_v9 = vld [vmem:[#allocation6 + $0x38] sm:$0xff]   ;;  %v1426_v10 = vld [vmem:[%s1840_s7 + $0x8] sm:$0xff]   ;;  %s1526_s15 = scalar_lea.vmem %s2035_s11, 4096  ;;  %p2104_p12 = scmp.ne.s32.totalorder %s2100_s27, 0 }
  0x70   : > { %1281 = vmatprep.mubr.bf16.mxu0 %v1424_v4  ;;  %1297 = vmatprep.mubr.bf16.mxu1 %v1425_v5  ;;  %v1427_v11 = vld [vmem:[%s1840_s7 + $0x48] sm:$0xff]   ;;  %v1428_v12 = vld [vmem:[%s1840_s7 + $0x10] sm:$0xff]   ;;  %v1430_v14 = vld [vmem:[%s1840_s7 + $0x18] sm:$0xff]   ;;  %v792_v26 = vsub.s32 0, %v791_v25  ;;  %v828_v28 = vsub.s32 1, %v791_v25  ;;  %v896_v30 = vsub.s32 2, %v791_v25  ;;  %p1527_p8 = scmp.ne.s32.totalorder %s2035_s11, %s1526_s15 }
  0x71   : > { %v1429_v13 = vld [vmem:[%s1840_s7 + $0x50] sm:$0xff]   ;;  %v1431_v15 = vld [vmem:[%s1840_s7 + $0x58] sm:$0xff]   ;;  %v1432_v16 = vld [vmem:[%s1840_s7 + $0x20] sm:$0xff]   ;;  %s1619_s10 = smov [#allocation9]  }
  0x72   : > { %1268 = vmatpush3.bf16.msra.mxu0 %v1417_v1  ;;  %1322 = vmatpush3.bf16.msra.mxu1 %v1417_v1  ;;  %v1433_v17 = vld [vmem:[%s1840_s7 + $0x60] sm:$0xff]   ;;  %v1434_v18 = vld [vmem:[%s1840_s7 + $0x28] sm:$0xff]   ;;  %v1436_v20 = vld [vmem:[%s1840_s7 + $0x30] sm:$0xff]   ;;  %p1528_p1 = pnand %p1527_p8, %p2104_p12  ;;  %s1530_s30 = sshll.u32 %s1619_s10, 4  ;;  %s1531_s30 = int_to_ptr.vmem [resolvable:$false] %s1530_s30 }
  0x73   : > { %1269 = vmatprep.subr.bf16.mxu0 %v1418_v2  ;;  %1315 = vmatprep.subr.bf16.mxu1 %v1418_v2  ;;  %v1435_v19 = vld [vmem:[%s1840_s7 + $0x68] sm:$0xff]   ;;  %v1437_v21 = vld [vmem:[%s1840_s7 + $0x70] sm:$0xff]   ;;  %v1438_v22 = vld [vmem:[%s1840_s7 + $0x38] sm:$0xff]   ;;  %s1532_s21 = scalar_lea.vmem %s1531_s30, 8192  ;;  %p1533_p3 = scmp.lt.s32.totalorder %s2035_s11, %s1531_s30 }
  0x74   : > { %v1439_v23 = vld [vmem:[%s1840_s7 + $0x78] sm:$0xff]   ;;  %v757_v27 = vld [vmem:[#allocation8] sm:$0xff]  ;;  %p1529_p10 = pneg %p1528_p1  ;;  %p1534_p5 = scmp.lt.s32.totalorder %s1532_s21, %s1526_s15 }
  0x75   : > { %v1866_v29 = vrot.slane %v757_v27, %v792_v26  ;;  %v1868_v32 = vrot.slane %v757_v27, %v828_v28  ;;  %v1872_v40 = vrot.slane %v757_v27, %v896_v30 }
  0x76   : > { %1270 = vmatpush3.bf16.msra.mxu0 %v1418_v2  ;;  %1323 = vmatpush3.bf16.msra.mxu1 %v1418_v2  ;;  %p1535_p9 = por %p1534_p5, %p1533_p3 }
  0x77   : > { %1271 = vmatprep.subr.bf16.mxu0 %v1419_v3  ;;  %1316 = vmatprep.subr.bf16.mxu1 %v1419_v3 }
  0x78   : > { %p1536_p11 = pnand %p1535_p9, %p1529_p10 }
  0x7a   : > { %1272 = vmatpush3.bf16.msra.mxu0 %v1419_v3  ;;  %1324 = vmatpush3.bf16.msra.mxu1 %v1419_v3 }
  0x7b   : > { %1273 = vmatprep.subr.bf16.mxu0 %v1420_v6  ;;  %1317 = vmatprep.subr.bf16.mxu1 %v1420_v6 }
  0x7e   : > { %1274 = vmatpush3.bf16.msra.mxu0 %v1420_v6  ;;  %1325 = vmatpush3.bf16.msra.mxu1 %v1420_v6 }
  0x7f   : > { %1275 = vmatprep.subr.bf16.mxu0 %v1421_v7  ;;  %1318 = vmatprep.subr.bf16.mxu1 %v1421_v7 }
  0x82   : > { %1276 = vmatpush3.bf16.msra.mxu0 %v1421_v7  ;;  %1326 = vmatpush3.bf16.msra.mxu1 %v1421_v7 }
  0x83   : > { %1277 = vmatprep.subr.bf16.mxu0 %v1422_v8  ;;  %1319 = vmatprep.subr.bf16.mxu1 %v1422_v8 }
  0x86   : > { %1278 = vmatpush3.bf16.msra.mxu0 %v1422_v8  ;;  %1327 = vmatpush3.bf16.msra.mxu1 %v1422_v8 }
  0x87   : > { %1279 = vmatprep.subr.bf16.mxu0 %v1423_v9  ;;  %1320 = vmatprep.subr.bf16.mxu1 %v1423_v9 }
  0x8a   : > { %1280 = vmatpush3.bf16.msra.mxu0 %v1423_v9  ;;  %1328 = vmatpush3.bf16.msra.mxu1 %v1423_v9 }
  0x8d   : > { %1282 = vmatmul.mubr.bf16.vlgmr.msra.gmra.mrb[0].mxu0 %v1426_v10  ;;  %1298 = vmatmul.mubr.bf16.vlgmr.msra.gmra.mrb[0].mxu1 %v1427_v11 }
  0x8e   : > { %1285 = vmatprep.mubr.bf16.mxu0 %v1428_v12  ;;  %1301 = vmatprep.mubr.bf16.mxu1 %v1429_v13 }
  0x95   : > { %1286 = vmatmul.mubr.bf16.gmra.mrb[4].mxu0 %v1430_v14  ;;  %1302 = vmatmul.mubr.bf16.gmra.mrb[4].mxu1 %v1431_v15 }
  0x96   : > { %1289 = vmatprep.mubr.bf16.mxu0 %v1432_v16  ;;  %1305 = vmatprep.mubr.bf16.mxu1 %v1433_v17 }
  0x9d   : > { %1290 = vmatmul.mubr.bf16.gmra.mrb[8].mxu0 %v1434_v18  ;;  %1306 = vmatmul.mubr.bf16.gmra.mrb[8].mxu1 %v1435_v19 }
  0x9e   : > { %1293 = vmatprep.mubr.bf16.mxu0 %v1436_v20  ;;  %1309 = vmatprep.mubr.bf16.mxu1 %v1437_v21 }
  0xa5   : > { %1294 = vmatmul.mubr.bf16.gmra.mrb[12].mxu0 %v1438_v22  ;;  %1310 = vmatmul.mubr.bf16.gmra.mrb[12].mxu1 %v1439_v23 }
 0x160   : > { %v1283_v31 = vpop.f32.mrb[0].mxu0  ;;  %v1299_v33 = vpop.f32.mrb[0].mxu1 }
 0x161   : > { %v563_v34 = vpop.f32.mrb[1].mxu0  ;;  %v627_v35 = vpop.f32.mrb[1].mxu1  ;;  %v796_v41 = vmul.f32 %v1283_v31, %v1866_v29  ;;  %v812_v42 = vmul.f32 %v1299_v33, %v1866_v29 }
 0x162   : > { %v794_v36 = vmul.f32 %v1866_v29, %v563_v34  ;;  %v810_v37 = vmul.f32 %v1866_v29, %v627_v35  ;;  %v1284_v38 = vpop.f32.mrb[2].mxu0  ;;  %v1300_v39 = vpop.f32.mrb[2].mxu1 }
 0x163   : > { %v566_v43 = vpop.f32.mrb[3].mxu0  ;;  %v630_v44 = vpop.f32.mrb[3].mxu1  ;;  %v848_v52 = vadd.f32 %v1868_v32, %v812_v42  ;;  %v813_v53 = vmul.f32 %v1300_v39, %v1866_v29  ;;  %v832_v55 = vadd.f32 %v1868_v32, %v796_v41  ;;  %v797_v60 = vmul.f32 %v1284_v38, %v1866_v29 }
 0x164   : > { %v830_v45 = vadd.f32 %v1868_v32, %v794_v36  ;;  %v846_v46 = vadd.f32 %v1868_v32, %v810_v37  ;;  %v795_v47 = vmul.f32 %v1866_v29, %v566_v43  ;;  %v811_v48 = vmul.f32 %v1866_v29, %v630_v44 }
 0x165   : > { %v849_v3 = vadd.f32 %v1868_v32, %v813_v53  ;;  %v916_v6 = vmul.f32 %v1872_v40, %v848_v52  ;;  %vm880_vm4 = vcmp.ge.f32.partialorder %v848_v52, 0.0  ;;  %v833_v10 = vadd.f32 %v1868_v32, %v797_v60 }
 0x166   : > { %v831_v49 = vadd.f32 %v1868_v32, %v795_v47  ;;  %v847_v50 = vadd.f32 %v1868_v32, %v811_v48  ;;  %vm878_vm0 = vcmp.ge.f32.partialorder %v846_v46, 0.0  ;;  %v914_v51 = vmul.f32 %v1872_v40, %v846_v46 }
 0x167   : > { %vm862_vm1 = vcmp.ge.f32.partialorder %v830_v45, 0.0  ;;  %v898_v54 = vmul.f32 %v1872_v40, %v830_v45  ;;  %v900_v12 = vmul.f32 %v1872_v40, %v832_v55  ;;  %vm864_vm5 = vcmp.ge.f32.partialorder %v832_v55, 0.0 }
 0x168   : > { %v946_v56 = vsel %vm878_vm0, %v846_v46, %v914_v51  ;;  %v1287_v57 = vpop.f32.mrb[4].mxu0  ;;  %v1303_v58 = vpop.f32.mrb[4].mxu1  ;;  %v915_v59 = vmul.f32 %v1872_v40, %v847_v50  ;;  %vm879_vm2 = vcmp.ge.f32.partialorder %v847_v50, 0.0  ;;  %v899_v0 = vmul.f32 %v1872_v40, %v831_v49 }
 0x169   : > { %994 = vxpose.xlu1.b32.start [1/16] %v946_v56, 128  ;;  %v930_v61 = vsel %vm862_vm1, %v830_v45, %v898_v54  ;;  %v579_v62 = vpop.f32.mrb[5].mxu0  ;;  %v643_v63 = vpop.f32.mrb[5].mxu1  ;;  %vm863_vm3 = vcmp.ge.f32.partialorder %v831_v49, 0.0  ;;  %v948_v13 = vsel %vm880_vm4, %v848_v52, %v916_v6  ;;  %v917_v17 = vmul.f32 %v1872_v40, %v849_v3 }
 0x16a   : > { %962 = vxpose.xlu0.b32.start [1/16] %v930_v61, 128  ;;  %v1304_v1 = vpop.f32.mrb[6].mxu1  ;;  %v1288_v2 = vpop.f32.mrb[6].mxu0  ;;  %v798_v7 = vmul.f32 %v1866_v29, %v579_v62  ;;  %v814_v8 = vmul.f32 %v1866_v29, %v643_v63  ;;  %v947_v9 = vsel %vm879_vm2, %v847_v50, %v915_v59  ;;  %v931_v11 = vsel %vm863_vm3, %v831_v49, %v899_v0 }
 0x16b   : > { %v582_v4 = vpop.f32.mrb[7].mxu0  ;;  %v646_v5 = vpop.f32.mrb[7].mxu1  ;;  %v932_v21 = vsel %vm864_vm5, %v832_v55, %v900_v12  ;;  %vm881_vm6 = vcmp.ge.f32.partialorder %v849_v3, 0.0  ;;  %v901_v22 = vmul.f32 %v1872_v40, %v833_v10  ;;  %vm865_vm7 = vcmp.ge.f32.partialorder %v833_v10, 0.0 }
 0x16c   : > { %v834_v14 = vadd.f32 %v1868_v32, %v798_v7  ;;  %v850_v15 = vadd.f32 %v1868_v32, %v814_v8  ;;  %v815_v16 = vmul.f32 %v1866_v29, %v646_v5  ;;  %v799_v20 = vmul.f32 %v1866_v29, %v582_v4 }
 0x16d   : > { %995 = vxpose.xlu1.b32.cont [2/16] %v947_v9, 128  ;;  %v800_v27 = vmul.f32 %v1287_v57, %v1866_v29  ;;  %v816_v31 = vmul.f32 %v1303_v58, %v1866_v29  ;;  %v949_v34 = vsel %vm881_vm6, %v849_v3, %v917_v17  ;;  %v933_v37 = vsel %vm865_vm7, %v833_v10, %v901_v22 }
 0x16e   : > { %963 = vxpose.xlu0.b32.cont [2/16] %v931_v11, 128  ;;  %v851_v33 = vadd.f32 %v1868_v32, %v815_v16  ;;  %v918_v35 = vmul.f32 %v1872_v40, %v850_v15  ;;  %v835_v36 = vadd.f32 %v1868_v32, %v799_v20  ;;  %vm882_vm8 = vcmp.ge.f32.partialorder %v850_v15, 0.0 }
 0x16f   : > { %v902_v38 = vmul.f32 %v1872_v40, %v834_v14  ;;  %vm866_vm9 = vcmp.ge.f32.partialorder %v834_v14, 0.0  ;;  %v836_v39 = vadd.f32 %v1868_v32, %v800_v27  ;;  %v852_v41 = vadd.f32 %v1868_v32, %v816_v31 }
 0x170   : > { %v1900_v18 = vpop.f32.mrb[8].mxu0  ;;  %v1902_v19 = vpop.f32.mrb[8].mxu1  ;;  %v817_v42 = vmul.f32 %v1304_v1, %v1866_v29  ;;  %v950_v43 = vsel %vm882_vm8, %v850_v15, %v918_v35  ;;  %v919_v44 = vmul.f32 %v1872_v40, %v851_v33  ;;  %v801_v47 = vmul.f32 %v1288_v2, %v1866_v29 }
 0x171   : > { %996 = vxpose.xlu1.b32.cont [3/16] %v948_v13, 128  ;;  %v595_v23 = vpop.f32.mrb[9].mxu0  ;;  %v659_v24 = vpop.f32.mrb[9].mxu1  ;;  %v934_v48 = vsel %vm866_vm9, %v834_v14, %v902_v38  ;;  %vm883_vm10 = vcmp.ge.f32.partialorder %v851_v33, 0.0  ;;  %v903_v49 = vmul.f32 %v1872_v40, %v835_v36  ;;  %vm867_vm11 = vcmp.ge.f32.partialorder %v835_v36, 0.0 }
 0x172   : > { %964 = vxpose.xlu0.b32.cont [3/16] %v932_v21, 128  ;;  %v1906_v25 = vpop.f32.mrb[10].mxu1  ;;  %v1908_v26 = vpop.f32.mrb[10].mxu0  ;;  %v802_v54 = vmul.f32 %v1866_v29, %v595_v23  ;;  %v853_v57 = vadd.f32 %v1868_v32, %v817_v42  ;;  %v818_v58 = vmul.f32 %v1866_v29, %v659_v24  ;;  %v951_v59 = vsel %vm883_vm10, %v851_v33, %v919_v44 }
 0x173   : > { %v598_v28 = vpop.f32.mrb[11].mxu0  ;;  %v662_v30 = vpop.f32.mrb[11].mxu1  ;;  %v920_v60 = vmul.f32 %v1872_v40, %v852_v41  ;;  %v837_v61 = vadd.f32 %v1868_v32, %v801_v47  ;;  %v935_v62 = vsel %vm867_vm11, %v835_v36, %v903_v49  ;;  %vm884_vm12 = vcmp.ge.f32.partialorder %v852_v41, 0.0 }
 0x174   : > { %v904_v63 = vmul.f32 %v1872_v40, %v836_v39  ;;  %vm868_vm13 = vcmp.ge.f32.partialorder %v836_v39, 0.0  ;;  %v838_v0 = vadd.f32 %v1868_v32, %v802_v54  ;;  %v854_v1 = vadd.f32 %v1868_v32, %v818_v58 }
 0x175   : > { %997 = vxpose.xlu1.b32.cont [4/16] %v949_v34, 128  ;;  %v819_v2 = vmul.f32 %v1866_v29, %v662_v30  ;;  %v952_v3 = vsel %vm884_vm12, %v852_v41, %v920_v60  ;;  %v921_v4 = vmul.f32 %v1872_v40, %v853_v57  ;;  %v803_v5 = vmul.f32 %v1866_v29, %v598_v28 }
 0x176   : > { %965 = vxpose.xlu0.b32.cont [4/16] %v933_v37, 128  ;;  %v936_v6 = vsel %vm868_vm13, %v836_v39, %v904_v63  ;;  %vm885_vm14 = vcmp.ge.f32.partialorder %v853_v57, 0.0  ;;  %v905_v7 = vmul.f32 %v1872_v40, %v837_v61  ;;  %vm869_vm15 = vcmp.ge.f32.partialorder %v837_v61, 0.0 }
 0x177   : > { %v804_v8 = vmul.f32 %v1900_v18, %v1866_v29  ;;  %v820_v9 = vmul.f32 %v1902_v19, %v1866_v29  ;;  %v855_v10 = vadd.f32 %v1868_v32, %v819_v2  ;;  %v953_v11 = vsel %vm885_vm14, %v853_v57, %v921_v4 }
 0x178   : > { %v1920_v45 = vpop.f32.mrb[12].mxu0  ;;  %v1922_v46 = vpop.f32.mrb[12].mxu1  ;;  %v922_v12 = vmul.f32 %v1872_v40, %v854_v1  ;;  %v839_v13 = vadd.f32 %v1868_v32, %v803_v5  ;;  %v937_v14 = vsel %vm869_vm15, %v837_v61, %v905_v7  ;;  %vm886_vm0 = vcmp.ge.f32.partialorder %v854_v1, 0.0 }
 0x179   : > { %998 = vxpose.xlu1.b32.cont [5/16] %v950_v43, 128  ;;  %v611_v50 = vpop.f32.mrb[13].mxu0  ;;  %v675_v51 = vpop.f32.mrb[13].mxu1  ;;  %v906_v15 = vmul.f32 %v1872_v40, %v838_v0  ;;  %vm870_vm1 = vcmp.ge.f32.partialorder %v838_v0, 0.0  ;;  %v840_v16 = vadd.f32 %v1868_v32, %v804_v8  ;;  %v856_v17 = vadd.f32 %v1868_v32, %v820_v9 }
 0x17a   : > { %966 = vxpose.xlu0.b32.cont [5/16] %v934_v48, 128  ;;  %v1926_v52 = vpop.f32.mrb[14].mxu1  ;;  %v1928_v53 = vpop.f32.mrb[14].mxu0  ;;  %v821_v18 = vmul.f32 %v1906_v25, %v1866_v29  ;;  %v954_v19 = vsel %vm886_vm0, %v854_v1, %v922_v12  ;;  %v923_v20 = vmul.f32 %v1872_v40, %v855_v10  ;;  %v805_v21 = vmul.f32 %v1908_v26, %v1866_v29 }
 0x17b   : > { %v1931_v55 = vpop.f32.mrb[15].mxu0  ;;  %v678_v56 = vpop.f32.mrb[15].mxu1  ;;  %v938_v22 = vsel %vm870_vm1, %v838_v0, %v906_v15  ;;  %vm887_vm2 = vcmp.ge.f32.partialorder %v855_v10, 0.0  ;;  %v907_v23 = vmul.f32 %v1872_v40, %v839_v13  ;;  %vm871_vm3 = vcmp.ge.f32.partialorder %v839_v13, 0.0 }
 0x17c   : > { %v806_v24 = vmul.f32 %v1866_v29, %v611_v50  ;;  %v857_v27 = vadd.f32 %v1868_v32, %v821_v18  ;;  %v822_v28 = vmul.f32 %v1866_v29, %v675_v51  ;;  %v955_v25 = vsel %vm887_vm2, %v855_v10, %v923_v20 }
 0x17d   : > { %999 = vxpose.xlu1.b32.cont [6/16] %v951_v59, 128  ;;  %v924_v30 = vmul.f32 %v1872_v40, %v856_v17  ;;  %v841_v31 = vadd.f32 %v1868_v32, %v805_v21  ;;  %v939_v26 = vsel %vm871_vm3, %v839_v13, %v907_v23  ;;  %vm888_vm4 = vcmp.ge.f32.partialorder %v856_v17, 0.0 }
 0x17e   : > { %967 = vxpose.xlu0.b32.cont [6/16] %v935_v62, 128  ;;  %v908_v33 = vmul.f32 %v1872_v40, %v840_v16  ;;  %vm872_vm5 = vcmp.ge.f32.partialorder %v840_v16, 0.0  ;;  %v842_v34 = vadd.f32 %v1868_v32, %v806_v24  ;;  %v858_v35 = vadd.f32 %v1868_v32, %v822_v28 }
 0x17f   : > { %v823_v36 = vmul.f32 %v1866_v29, %v678_v56  ;;  %v956_v37 = vsel %vm888_vm4, %v856_v17, %v924_v30  ;;  %v925_v38 = vmul.f32 %v1872_v40, %v857_v27  ;;  %v807_v39 = vmul.f32 %v1866_v29, %v1931_v55 }
 0x180   : > { %v940_v41 = vsel %vm872_vm5, %v840_v16, %v908_v33  ;;  %vm889_vm6 = vcmp.ge.f32.partialorder %v857_v27, 0.0  ;;  %v909_v42 = vmul.f32 %v1872_v40, %v841_v31  ;;  %vm873_vm7 = vcmp.ge.f32.partialorder %v841_v31, 0.0 }
 0x181   : > { %1000 = vxpose.xlu1.b32.cont [7/16] %v952_v3, 128  ;;  %v808_v43 = vmul.f32 %v1920_v45, %v1866_v29  ;;  %v824_v44 = vmul.f32 %v1922_v46, %v1866_v29  ;;  %v859_v47 = vadd.f32 %v1868_v32, %v823_v36  ;;  %v957_v48 = vsel %vm889_vm6, %v857_v27, %v925_v38 }
 0x182   : > { %968 = vxpose.xlu0.b32.cont [7/16] %v936_v6, 128  ;;  %v926_v49 = vmul.f32 %v1872_v40, %v858_v35  ;;  %v843_v50 = vadd.f32 %v1868_v32, %v807_v39  ;;  %v941_v51 = vsel %vm873_vm7, %v841_v31, %v909_v42  ;;  %vm890_vm8 = vcmp.ge.f32.partialorder %v858_v35, 0.0 }
 0x183   : > { %v910_v54 = vmul.f32 %v1872_v40, %v842_v34  ;;  %vm874_vm9 = vcmp.ge.f32.partialorder %v842_v34, 0.0  ;;  %v844_v55 = vadd.f32 %v1868_v32, %v808_v43  ;;  %v860_v45 = vadd.f32 %v1868_v32, %v824_v44 }
 0x184   : > { %v825_v46 = vmul.f32 %v1926_v52, %v1866_v29  ;;  %v958_v56 = vsel %vm890_vm8, %v858_v35, %v926_v49  ;;  %v927_v57 = vmul.f32 %v1872_v40, %v859_v47  ;;  %v809_v58 = vmul.f32 %v1928_v53, %v1866_v29 }
 0x185   : > { %1001 = vxpose.xlu1.b32.cont [8/16] %v953_v11, 128  ;;  %v942_v59 = vsel %vm874_vm9, %v842_v34, %v910_v54  ;;  %vm891_vm10 = vcmp.ge.f32.partialorder %v859_v47, 0.0  ;;  %v911_v60 = vmul.f32 %v1872_v40, %v843_v50  ;;  %vm875_vm11 = vcmp.ge.f32.partialorder %v843_v50, 0.0 }
 0x186   : > { %969 = vxpose.xlu0.b32.cont [8/16] %v937_v14, 128  ;;  %v861_v61 = vadd.f32 %v1868_v32, %v825_v46  ;;  %v959_v62 = vsel %vm891_vm10, %v859_v47, %v927_v57  ;;  %v928_v63 = vmul.f32 %v1872_v40, %v860_v45  ;;  %v845_v52 = vadd.f32 %v1868_v32, %v809_v58 }
 0x187   : > { %v943_v0 = vsel %vm875_vm11, %v843_v50, %v911_v60  ;;  %vm892_vm12 = vcmp.ge.f32.partialorder %v860_v45, 0.0  ;;  %v912_v29 = vmul.f32 %v1872_v40, %v844_v55  ;;  %vm876_vm13 = vcmp.ge.f32.partialorder %v844_v55, 0.0 }
 0x188   : > { %v960_v53 = vsel %vm892_vm12, %v860_v45, %v928_v63  ;;  %v929_v1 = vmul.f32 %v1872_v40, %v861_v61  ;;  %vm893_vm14 = vcmp.ge.f32.partialorder %v861_v61, 0.0  ;;  %v913_v3 = vmul.f32 %v1872_v40, %v845_v52 }
 0x189   : > { %1002 = vxpose.xlu1.b32.cont [9/16] %v954_v19, 128  ;;  %v944_v2 = vsel %vm876_vm13, %v844_v55, %v912_v29  ;;  %vm877_vm15 = vcmp.ge.f32.partialorder %v845_v52, 0.0 }
 0x18a   : > { %970 = vxpose.xlu0.b32.cont [9/16] %v938_v22, 128  ;;  %v961_v4 = vsel %vm893_vm14, %v861_v61, %v929_v1  ;;  %v945_v32 = vsel %vm877_vm15, %v845_v52, %v913_v3 }
 0x18d   : > { %1003 = vxpose.xlu1.b32.cont [10/16] %v955_v25, 128 }
 0x18e   : > { %971 = vxpose.xlu0.b32.cont [10/16] %v939_v26, 128 }
 0x191   : > { %1004 = vxpose.xlu1.b32.cont [11/16] %v956_v37, 128 }
 0x192   : > { %972 = vxpose.xlu0.b32.cont [11/16] %v940_v41, 128 }
 0x195   : > { %1005 = vxpose.xlu1.b32.cont [12/16] %v957_v48, 128 }
 0x196   : > { %973 = vxpose.xlu0.b32.cont [12/16] %v941_v51, 128 }
 0x199   : > { %1006 = vxpose.xlu1.b32.cont [13/16] %v958_v56, 128 }
 0x19a   : > { %974 = vxpose.xlu0.b32.cont [13/16] %v942_v59, 128 }
 0x19d   : > { %1007 = vxpose.xlu1.b32.cont [14/16] %v959_v62, 128 }
 0x19e   : > { %975 = vxpose.xlu0.b32.cont [14/16] %v943_v0, 128 }
 0x1a1   : > { %1008 = vxpose.xlu1.b32.cont [15/16] %v960_v53, 128 }
 0x1a2   : > { %976 = vxpose.xlu0.b32.cont [15/16] %v944_v2, 128 }
 0x1a5   : > { %1009 = vxpose.xlu1.b32.end [16/16] %v961_v4, 128 }
 0x1a6   : > { %977 = vxpose.xlu0.b32.end [16/16] %v945_v32, 128 }
 0x1e9   : > { %v1010_v5 = vpop.trf.xlu1 }
 0x1ea   : > { %1027 = vst [vmem:[%s1996_s22 + $0x8] sm:$0xff] %v1010_v5  ;;  %v978_v40 = vpop.trf.xlu0 }
 0x1eb   : > { %1026 = vst [vmem:[%s1996_s22] sm:$0xff] %v978_v40 }
 0x1ed   : > { %v1011_v6 = vpop.trf.xlu1 }
 0x1ee   : > { %1029 = vst [vmem:[%s1996_s22 + $0x18] sm:$0xff] %v1011_v6  ;;  %v979_v7 = vpop.trf.xlu0 }
 0x1ef   : > { %1028 = vst [vmem:[%s1996_s22 + $0x10] sm:$0xff] %v979_v7 }
 0x1f1   : > { %v1012_v8 = vpop.trf.xlu1 }
 0x1f2   : > { %1031 = vst [vmem:[%s1996_s22 + $0x28] sm:$0xff] %v1012_v8  ;;  %v980_v9 = vpop.trf.xlu0 }
 0x1f3   : > { %1030 = vst [vmem:[%s1996_s22 + $0x20] sm:$0xff] %v980_v9 }
 0x1f5   : > { %v1013_v10 = vpop.trf.xlu1 }
 0x1f6   : > { %1033 = vst [vmem:[%s1996_s22 + $0x38] sm:$0xff] %v1013_v10  ;;  %v981_v11 = vpop.trf.xlu0 }
 0x1f7   : > { %1032 = vst [vmem:[%s1996_s22 + $0x30] sm:$0xff] %v981_v11 }
 0x1f9   : > { %v1014_v12 = vpop.trf.xlu1 }
 0x1fa   : > { %1035 = vst [vmem:[%s1996_s22 + $0x48] sm:$0xff] %v1014_v12  ;;  %v982_v13 = vpop.trf.xlu0 }
 0x1fb   : > { %1034 = vst [vmem:[%s1996_s22 + $0x40] sm:$0xff] %v982_v13 }
 0x1fd   : > { %v1015_v14 = vpop.trf.xlu1 }
 0x1fe   : > { %1037 = vst [vmem:[%s1996_s22 + $0x58] sm:$0xff] %v1015_v14  ;;  %v983_v15 = vpop.trf.xlu0 }
 0x1ff   : > { %1036 = vst [vmem:[%s1996_s22 + $0x50] sm:$0xff] %v983_v15 }
 0x201   : > { %v1016_v16 = vpop.trf.xlu1 }
 0x202   : > { %1039 = vst [vmem:[%s1996_s22 + $0x68] sm:$0xff] %v1016_v16  ;;  %v984_v17 = vpop.trf.xlu0 }
 0x203   : > { %1038 = vst [vmem:[%s1996_s22 + $0x60] sm:$0xff] %v984_v17 }
 0x205   : > { %v1017_v18 = vpop.trf.xlu1 }
 0x206   : > { %1041 = vst [vmem:[%s1996_s22 + $0x78] sm:$0xff] %v1017_v18  ;;  %v985_v19 = vpop.trf.xlu0 }
 0x207   : > { %1040 = vst [vmem:[%s1996_s22 + $0x70] sm:$0xff] %v985_v19 }
 0x209   : > { %v1018_v20 = vpop.trf.xlu1 }
 0x20a   : > { %1043 = vst [vmem:[%s1996_s22 + $0x88] sm:$0xff] %v1018_v20  ;;  %v986_v21 = vpop.trf.xlu0 }
 0x20b   : > { %1042 = vst [vmem:[%s1996_s22 + $0x80] sm:$0xff] %v986_v21 }
 0x20d   : > { %v1019_v22 = vpop.trf.xlu1 }
 0x20e   : > { %1045 = vst [vmem:[%s1996_s22 + $0x98] sm:$0xff] %v1019_v22  ;;  %v987_v23 = vpop.trf.xlu0 }
 0x20f   : > { %1044 = vst [vmem:[%s1996_s22 + $0x90] sm:$0xff] %v987_v23 }
 0x211   : > { %v1020_v24 = vpop.trf.xlu1 }
 0x212   : > { %1047 = vst [vmem:[%s1996_s22 + $0xa8] sm:$0xff] %v1020_v24  ;;  %v988_v27 = vpop.trf.xlu0 }
 0x213   : > { %1046 = vst [vmem:[%s1996_s22 + $0xa0] sm:$0xff] %v988_v27 }
 0x215   : > { %v1021_v28 = vpop.trf.xlu1 }
 0x216   : > { %1049 = vst [vmem:[%s1996_s22 + $0xb8] sm:$0xff] %v1021_v28  ;;  %v989_v25 = vpop.trf.xlu0 }
 0x217   : > { %1048 = vst [vmem:[%s1996_s22 + $0xb0] sm:$0xff] %v989_v25 }
 0x219   : > { %v1022_v30 = vpop.trf.xlu1 }
 0x21a   : > { %1051 = vst [vmem:[%s1996_s22 + $0xc8] sm:$0xff] %v1022_v30  ;;  %v990_v31 = vpop.trf.xlu0 }
 0x21b   : > { %1050 = vst [vmem:[%s1996_s22 + $0xc0] sm:$0xff] %v990_v31 }
 0x21d   : > { %v1023_v26 = vpop.trf.xlu1 }
 0x21e   : > { %1053 = vst [vmem:[%s1996_s22 + $0xd8] sm:$0xff] %v1023_v26  ;;  %v991_v33 = vpop.trf.xlu0 }
 0x21f   : > { %1052 = vst [vmem:[%s1996_s22 + $0xd0] sm:$0xff] %v991_v33 }
 0x221   : > { %v1024_v34 = vpop.trf.xlu1 }
 0x222   : > { %1055 = vst [vmem:[%s1996_s22 + $0xe8] sm:$0xff] %v1024_v34  ;;  %v992_v35 = vpop.trf.xlu0 }
 0x223   : > { %1054 = vst [vmem:[%s1996_s22 + $0xe0] sm:$0xff] %v992_v35 }
 0x225   : > { %v1025_v36 = vpop.trf.xlu1 }
 0x226   : > { %1057 = vst [vmem:[%s1996_s22 + $0xf8] sm:$0xff] %v1025_v36  ;;  %v993_v37 = vpop.trf.xlu0 }
 0x227   : > { %1056 = vst [vmem:[%s1996_s22 + $0xf0] sm:$0xff] %v993_v37 }
 0x228   : > { %1539 = shalt.err (!%p1536_p11)
}
 0x229   : > { %s1540_s28 = scalar_lea.hbm %s2033_s26, 4096  ;;  %s1544_s6 = scalar_lea.hbm %s2089_s3, 8192 }
 0x22a   : > { %p1541_p0 = scmp.ne.s32.totalorder %s2033_s26, %s1540_s28  ;;  %p1545_p6 = scmp.lt.u32.totalorder %s2033_s26, %s2089_s3 }
 0x22b   : > { %p1546_p7 = scmp.lt.u32.totalorder %s1544_s6, %s1540_s28  ;;  %p1548_p8 = scmp.lt.u32.totalorder %s1540_s28, %s2033_s26 }
 0x22c   : > { %p1542_p4 = pnand %p1541_p0, %p2104_p12 }
 0x22d   : > { %p1547_p2 = por %p1546_p7, %p1545_p6 }
 0x22e   : > { %p1543_p13 = pneg %p1542_p4 }
 0x22f   : > { %p1549_p1 = por %p1548_p8, %p1547_p2 }
 0x231   : > { %p1550_p10 = pnand %p1549_p1, %p1543_p13 }
 0x233   : > { %1553 = shalt.err (!%p1550_p10)
}
 0x234   : > { %s1620_s22 = smov 256   ;;  %s1621_s24 = smov 16  }
 0x235   : > { %1339 = dma.vmem_to_hbm [thread:$0]  (%p2104_p12), %s2035_s11, 4096, %s2033_s26, %s1059_s9, %s1620_s22, %s1620_s22, %s1621_s24  }
 0x236 PF: > { %s1092_s18 = sand.u32 1, %s1592_s12   ;;  %p2105_p3 = scmp.ne.s32.totalorder %s2097_s23, 0 }
 0x237   : > { %p2106_p5 = scmp.ge.s32.totalorder %s1612_s17, 2  ;;  %s1093_s8 = scalar_lea.sflag [#allocation5], %s1092_s18 }
 0x239   : > { %p1353_p9 = pnand %p2106_p5, %p2105_p3 }
 0x23b   : > { %1587 = dma.done.wait (!%p1353_p9), %s1093_s8, 4096  }
 0x23c   : > { %1589 = vsyncadd (!%p1353_p9), %s1093_s8, 4294963200  ;;  %s20_s17 = sadd.s32 1, %s1612_s17   ;;  %s2107_s12 = smov %s1596_s13 }
 0x23d   : > { %p17_p11 = scmp.ge.s32.totalorder %s20_s17, 4   ;;  %s2108_s13 = smov %s1600_s14 }
 0x23e   : > { %s2109_s14 = smov %s1787_s5  ;;  %s2110_s15 = smov %s1608_s16 }
 0x23f   : > { %s2111_s16 = smov %s2113_s19  ;;  %19 = sbr.rel (!%p17_p11) target bundleno = 7 (0x7), region = 95 }
 0x246   :  { %1098 = vsyncpa [#allocation4], 1 }
 0x247   :  { %1100 = vsyncpa [#allocation4 + $0x1], 1 }
 0x248   :  { %1101 = vsyncpa [#allocation7], 1 }
 0x249   :  { %1102 = vsyncpa [#allocation5], 1 }
 0x24a   :  { %1104 = vsyncpa [#allocation5 + $0x1], 1 }

</bundles_post_ra>
